<compile_context>
chip_gen: v5e
topology: v5e:2x2
jax: 0.10.0
libtpu: 0.0.40
codegen_flags: <defaults>
</compile_context>

<pallas_src>
import functools
import math

import jax
import jax.numpy as jnp
from jax import lax
from jax.experimental import pallas as pl
from jax.experimental.pallas import tpu as pltpu


def _accumulate_tile(p_ref, t_ref, o_ref, *, rows, num_chunks, unroll,
                     masked, base_col, n_valid):
    """Stream the (rows, tile_cols) tile in 128-lane chunks, accumulating
    sum(tanh(p)), sum(tanh(p)*t) and sum(t) into the resident output block."""
    if masked:
        lane = lax.broadcasted_iota(jnp.int32, (rows, 128), 1)   # hoisted once

    def body(c, carry):
        a_th, a_tt, a_t = carry
        off = pl.multiple_of(c * 128, 128)
        x = p_ref[:, pl.ds(off, 128)].astype(jnp.float32)
        t = t_ref[:, pl.ds(off, 128)].astype(jnp.float32)
        th = jnp.tanh(x)                                         # EUP
        if masked:
            # Mask th and t BEFORE the multiply: garbage (possibly NaN) read
            # past the array end must not leak into the accumulators.
            valid = lane < (n_valid - base_col - off)
            th = jnp.where(valid, th, 0.0)
            t = jnp.where(valid, t, 0.0)
        return a_th + th, a_tt + th * t, a_t + t

    zero = jnp.zeros((rows, 128), jnp.float32)
    a_th, a_tt, a_t = lax.fori_loop(0, num_chunks, body, (zero, zero, zero),
                                    unroll=unroll)
    o_ref[0] += a_th   # sum tanh(preds)
    o_ref[1] += a_tt   # sum tanh(preds) * target
    o_ref[2] += a_t    # sum target


def _soft_dice_kernel(p_ref, t_ref, o_ref, *, tile_cols, n_valid_cols,
                      need_mask, unroll):
    j = pl.program_id(1)
    tile_idx = pl.program_id(0) * pl.num_programs(1) + j

    @pl.when(j == 0)
    def _init():
        o_ref[...] = jnp.zeros_like(o_ref)

    rows = p_ref.shape[0]
    num_chunks = tile_cols // 128
    acc = functools.partial(_accumulate_tile, p_ref, t_ref, o_ref,
                            rows=rows, num_chunks=num_chunks, unroll=unroll)

    if not need_mask:
        acc(masked=False, base_col=0, n_valid=0)
    else:
        # Only tiles reaching past the valid columns (the ragged last tile or
        # the clamped duplicate step on an odd tile count) pay for the mask.
        overhang = (tile_idx + 1) * tile_cols > n_valid_cols

        @pl.when(jnp.logical_not(overhang))
        def _full():
            acc(masked=False, base_col=0, n_valid=0)

        @pl.when(overhang)
        def _ragged():
            acc(masked=True, base_col=tile_idx * tile_cols,
                n_valid=n_valid_cols)


def _choose_rows_cols(b, n, min_itemsize):
    """Pick k (n % k == 0) so rows = b*k is a multiple of 8 and cols = n // k
    keeps >= 1 full 128-lane chunk.  Prefer rows in [32, 64] (good sublane
    packing while the 3 (rows,128) accumulators stay in vregs), then the
    dtype-preferred sublane multiple, then cols % 128 == 0 (no ragged tail),
    then the smallest such rows."""
    sub_pref = max(8, 32 // max(1, min_itemsize))
    divisors = set()
    i = 1
    while i * i <= n:
        if n % i == 0:
            divisors.add(i)
            divisors.add(n // i)
        i += 1
    best, best_score = None, None
    for k in sorted(divisors):
        rows, cols = b * k, n // k
        if rows % 8 != 0 or rows > 256 or cols < 128:
            continue
        band = 0 if 32 <= rows <= 64 else (32 - rows if rows < 32 else rows - 64)
        score = (band,
                 0 if rows % sub_pref == 0 else 1,
                 0 if cols % 128 == 0 else 1,
                 rows)
        if best_score is None or score < best_score:
            best, best_score = (rows, cols, k), score
    if best is None:
        return b, n, 1          # rows == batch (block dim == full dim), masked tail
    return best


def _vmem_budgets():
    """(double-buffered input-tile budget, vmem_limit_bytes), generation-aware."""
    mib = 1024 * 1024
    try:
        cap = int(pltpu.get_tpu_info().vmem_capacity_bytes)
    except Exception:
        cap = 0
    if cap >= 100 * mib:        # v5e / v6e class: 128 MiB VMEM
        return 64 * mib, 96 * mib
    if cap > 0:                 # v7x class: 64 MiB per TensorCore
        return 24 * mib, 40 * mib
    return 24 * mib, 48 * mib   # unknown generation: known-good conservative sizes


def _soft_dice_loss_ref(preds, target, smooth=1.0):
    b = preds.shape[0]
    prob = 0.5 * (jnp.tanh(preds.astype(jnp.float32)) + 1.0)
    prob = prob.reshape(b, -1)
    t = target.reshape(b, -1).astype(jnp.float32)
    inter = jnp.sum(prob * t, axis=1)
    dsc = (2.0 * inter + smooth) / (jnp.sum(t, axis=1) + jnp.sum(prob, axis=1) + smooth)
    return jnp.mean(dsc)


def soft_dice_loss(preds, target, *, num_classes=2, smooth=1.0, logits=True,
                   max_tile_cols=None, min_pallas_elems=1 << 20):
    """Pallas implementation of SoftDiceLoss.forward (binary, logits=True)."""
    assert logits, "only the logits=True path is implemented here"
    assert num_classes <= 2  # TODO(synk): num_classes>2 one-hot path not implemented (module default is 2)
    # TODO(synk): torch's runtime assert max(target)<=1 has no in-kernel equivalent; caller must pass binary targets.

    b = preds.shape[0]
    n = math.prod(preds.shape[1:])          # elements per batch (true N)

    # Tiny inputs: pallas_call prologue/DMA setup dominates; XLA fusion wins.
    if b * n < min_pallas_elems:
        return _soft_dice_loss_ref(preds, target, smooth)

    min_itemsize = min(preds.dtype.itemsize, target.dtype.itemsize)
    rows, cols, _ = _choose_rows_cols(b, n, min_itemsize)
    if cols < 128:
        return _soft_dice_loss_ref(preds, target, smooth)

    p2 = preds.reshape(rows, cols)          # free row-major metadata reshape
    t2 = target.reshape(rows, cols)

    # Tile size: as large as the generation-aware VMEM budget allows
    # (2 inputs x 2 pipeline buffers), never wider than the array itself.
    input_budget, vmem_limit = _vmem_budgets()
    bytes_per_col = 2 * rows * (p2.dtype.itemsize + t2.dtype.itemsize)
    budget_cols = max(128, (input_budget // bytes_per_col) // 128 * 128)
    cap_cols = max(128, (cols // 128) * 128)      # last tile may still overhang
    if max_tile_cols is not None:
        cap_cols = min(cap_cols, max(128, (max_tile_cols // 128) * 128))
    tile_cols = int(min(cap_cols, budget_cols))

    num_tiles = pl.cdiv(cols, tile_cols)
    n_par = 2 if num_tiles >= 2 else 1            # dual-TensorCore split (v7x)
    n_steps = pl.cdiv(num_tiles, n_par)
    padded_tiles = n_par * n_steps
    need_mask = padded_tiles * tile_cols != cols

    num_chunks = tile_cols // 128
    unroll = 4 if num_chunks % 4 == 0 else (2 if num_chunks % 2 == 0 else 1)

    if padded_tiles == num_tiles:
        col_map = lambda p, j: (0, p * n_steps + j)
    else:
        # Odd tile count: the extra step re-reads the last real tile (clamped
        # block index, no OOB DMA) and is fully masked out in-kernel.
        col_map = lambda p, j: (0, jnp.minimum(p * n_steps + j, num_tiles - 1))

    kernel = functools.partial(_soft_dice_kernel,
                               tile_cols=tile_cols,
                               n_valid_cols=int(cols),
                               need_mask=bool(need_mask),
                               unroll=int(unroll))

    parts = pl.pallas_call(
        kernel,
        out_shape=jax.ShapeDtypeStruct((n_par, 3, rows, 128), jnp.float32),
        grid_spec=pltpu.PrefetchScalarGridSpec(
            num_scalar_prefetch=0,
            grid=(n_par, n_steps),
            in_specs=[
                pl.BlockSpec((rows, tile_cols), col_map),
                pl.BlockSpec((rows, tile_cols), col_map),
            ],
            out_specs=pl.BlockSpec((None, 3, rows, 128), lambda p, j: (p, 0, 0, 0)),
        ),
        compiler_params=pltpu.CompilerParams(
            dimension_semantics=("parallel", "arbitrary"),
            vmem_limit_bytes=int(vmem_limit),
        ),
    )(p2, t2)

    # Tiny epilogue: cross-lane + cross-core + per-batch combine, then the
    # folded dice math.  prob = 0.5*(tanh+1)  =>
    #   2*sum(prob*t) = s_tt + s_t ;  sum(prob) = 0.5*s_tanh + 0.5*N.
    s = jnp.sum(parts, axis=(0, 3))                      # (3, rows)
    s = jnp.sum(s.reshape(3, b, rows // b), axis=2)      # (3, b)
    s_tanh, s_tt, s_t = s[0], s[1], s[2]
    smooth = float(smooth)
    dsc = (s_tt + s_t + smooth) / (s_t + 0.5 * s_tanh + 0.5 * float(n) + smooth)
    return jnp.mean(dsc)


if __name__ == "__main__":
    key = jax.random.PRNGKey(0)

    def check(loss, ref, tag, tol=1e-5):
        assert jnp.allclose(loss, ref, atol=tol, rtol=tol), (tag, float(loss), float(ref))

    # 1) Module-default shape (2,4,16,16): single-tile, sublane-packed path.
    #    (min_pallas_elems=0 forces the Pallas kernel for these small tests.)
    k1, k2 = jax.random.split(key)
    preds = jax.random.normal(k1, (2, 4, 16, 16), dtype=jnp.float32)
    target = jax.random.bernoulli(k2, 0.4, (2, 4, 16, 16)).astype(jnp.float32)
    loss = jax.block_until_ready(soft_dice_loss(preds, target, min_pallas_elems=0))
    check(loss, _soft_dice_loss_ref(preds, target), "default-shape")

    # 1b) Same input through the default tiny-input XLA short-circuit.
    loss0 = jax.block_until_ready(soft_dice_loss(preds, target))
    check(loss0, _soft_dice_loss_ref(preds, target), "tiny-shortcircuit")

    # 2) Even tile count: 2-way "parallel" split with a ragged (masked) tile.
    k3, k4 = jax.random.split(k2)
    preds2 = jax.random.normal(k3, (2, 4, 24, 20), dtype=jnp.float32)
    target2 = jax.random.bernoulli(k4, 0.3, (2, 4, 24, 20)).astype(jnp.float32)
    loss2 = jax.block_until_ready(
        soft_dice_loss(preds2, target2, max_tile_cols=128, min_pallas_elems=0))
    check(loss2, _soft_dice_loss_ref(preds2, target2), "even-tiles-ragged")

    # 3) Odd tile count: clamped duplicate step (fully masked) + ragged tile.
    k5, k6 = jax.random.split(k4)
    preds3 = jax.random.normal(k5, (2, 4, 40, 30), dtype=jnp.float32)
    target3 = jax.random.bernoulli(k6, 0.5, (2, 4, 40, 30)).astype(jnp.float32)
    loss3 = jax.block_until_ready(
        soft_dice_loss(preds3, target3, max_tile_cols=128, min_pallas_elems=0))
    check(loss3, _soft_dice_loss_ref(preds3, target3), "odd-tiles-dup")

    # 4) bf16 inputs (halved HBM stream); f32 in-kernel math / accumulation.
    k7, k8 = jax.random.split(k6)
    preds4 = jax.random.normal(k7, (2, 4, 32, 32), dtype=jnp.bfloat16)
    target4 = jax.random.bernoulli(k8, 0.4, (2, 4, 32, 32)).astype(jnp.bfloat16)
    loss4 = jax.block_until_ready(soft_dice_loss(preds4, target4, min_pallas_elems=0))
    check(loss4, _soft_dice_loss_ref(preds4, target4), "bf16", tol=2e-5)

    # 5) Awkward N (no 8-multiple row packing possible): rows==batch fallback
    #    with in-kernel masked ragged tail (no jnp.pad HBM copy anymore).
    k9, k10 = jax.random.split(k8)
    preds5 = jax.random.normal(k9, (2, 3, 15, 15), dtype=jnp.float32)
    target5 = jax.random.bernoulli(k10, 0.5, (2, 3, 15, 15)).astype(jnp.float32)
    loss5 = jax.block_until_ready(soft_dice_loss(preds5, target5, min_pallas_elems=0))
    check(loss5, _soft_dice_loss_ref(preds5, target5), "fallback-rows")

    print("KERNEL_OK")
</pallas_src>

<mosaic_0001>
module attributes {stable_mosaic.version = 11 : i64} {
  func.func @_soft_dice_kernel(%arg0: i32, %arg1: i32, %arg2: memref<16x128xf32, #tpu.memory_space<vmem>>, %arg3: memref<16x128xf32, #tpu.memory_space<vmem>>, %arg4: memref<1x3x16x128xf32, #tpu.memory_space<vmem>>) attributes {dimension_semantics = [#tpu.dimension_semantics<parallel>, #tpu.dimension_semantics<arbitrary>], iteration_bounds = array<i64: 1, 1>, scalar_prefetch = 0 : i64, scratch_operands = 0 : i64, tpu.core_type = #tpu.core_type<tc>, window_params = [{transform_indices = @transform_0, window_bounds = array<i64: 16, 128>}, {transform_indices = @transform_1, window_bounds = array<i64: 16, 128>}, {transform_indices = @transform_2, window_bounds = array<i64: 1, 3, 16, 128>}]} {
    %c0_i32 = arith.constant 0 : i32
    %0 = arith.cmpi eq, %arg1, %c0_i32 : i32
    %1 = arith.extui %0 : i1 to i32
    %c0_i32_0 = arith.constant 0 : i32
    %2 = arith.cmpi ne, %1, %c0_i32_0 : i32
    scf.if %2 {
      %cst_25 = arith.constant 0.000000e+00 : f32
      %33 = vector.broadcast %cst_25 : f32 to vector<3x16x128xf32>
      %c0_26 = arith.constant 0 : index
      %c0_27 = arith.constant 0 : index
      %c0_28 = arith.constant 0 : index
      %c0_29 = arith.constant 0 : index
      %34 = vector.load %arg4[%c0_26, %c0_27, %c0_28, %c0_29] : memref<1x3x16x128xf32, #tpu.memory_space<vmem>>, vector<1x3x16x128xf32>
      %35 = vector.shape_cast %34 : vector<1x3x16x128xf32> to vector<3x16x128xf32>
      %36 = vector.shape_cast %33 : vector<3x16x128xf32> to vector<1x3x16x128xf32>
      tpu.vector_store %arg4[%c0_26, %c0_27, %c0_28, %c0_29], %36 {strides = array<i32>} : memref<1x3x16x128xf32, #tpu.memory_space<vmem>>, vector<1x3x16x128xf32>,
    } else {
    }
    %cst = arith.constant 0.000000e+00 : f32
    %3 = vector.broadcast %cst : f32 to vector<16x128xf32>
    %c0_i32_1 = arith.constant 0 : i32
    %c128_i32 = arith.constant 128 : i32
    %4 = arith.muli %c0_i32_1, %c128_i32 : i32
    %5 = tpu.assume_multiple %4, 128 : i32
    %c0 = arith.constant 0 : index
    %6 = arith.index_cast %5 : i32 to index
    %7 = vector.load %arg2[%c0, %6] : memref<16x128xf32, #tpu.memory_space<vmem>>, vector<16x128xf32>
    %c0_2 = arith.constant 0 : index
    %8 = arith.index_cast %5 : i32 to index
    %9 = vector.load %arg3[%c0_2, %8] : memref<16x128xf32, #tpu.memory_space<vmem>>, vector<16x128xf32>
    %10 = math.tanh %7 : vector<16x128xf32>
    %11 = arith.addf %3, %10 : vector<16x128xf32>
    %12 = arith.mulf %10, %9 : vector<16x128xf32>
    %13 = arith.addf %3, %12 : vector<16x128xf32>
    %14 = arith.addf %3, %9 : vector<16x128xf32>
    %c1_i32 = arith.constant 1 : i32
    %c0_3 = arith.constant 0 : index
    %c0_4 = arith.constant 0 : index
    %c0_5 = arith.constant 0 : index
    %c0_6 = arith.constant 0 : index
    %15 = vector.load %arg4[%c0_3, %c0_4, %c0_5, %c0_6] : memref<1x3x16x128xf32, #tpu.memory_space<vmem>>, vector<1x1x16x128xf32>
    %16 = vector.shape_cast %15 : vector<1x1x16x128xf32> to vector<16x128xf32>
    %17 = arith.addf %16, %11 : vector<16x128xf32>
    %c0_7 = arith.constant 0 : index
    %c0_8 = arith.constant 0 : index
    %c0_9 = arith.constant 0 : index
    %c0_10 = arith.constant 0 : index
    %18 = vector.load %arg4[%c0_7, %c0_8, %c0_9, %c0_10] : memref<1x3x16x128xf32, #tpu.memory_space<vmem>>, vector<1x1x16x128xf32>
    %19 = vector.shape_cast %18 : vector<1x1x16x128xf32> to vector<16x128xf32>
    %20 = vector.shape_cast %17 : vector<16x128xf32> to vector<1x1x16x128xf32>
    tpu.vector_store %arg4[%c0_7, %c0_8, %c0_9, %c0_10], %20 {strides = array<i32>} : memref<1x3x16x128xf32, #tpu.memory_space<vmem>>, vector<1x1x16x128xf32>,
    %c0_11 = arith.constant 0 : index
    %c1 = arith.constant 1 : index
    %c0_12 = arith.constant 0 : index
    %c0_13 = arith.constant 0 : index
    %21 = vector.load %arg4[%c0_11, %c1, %c0_12, %c0_13] : memref<1x3x16x128xf32, #tpu.memory_space<vmem>>, vector<1x1x16x128xf32>
    %22 = vector.shape_cast %21 : vector<1x1x16x128xf32> to vector<16x128xf32>
    %23 = arith.addf %22, %13 : vector<16x128xf32>
    %c0_14 = arith.constant 0 : index
    %c1_15 = arith.constant 1 : index
    %c0_16 = arith.constant 0 : index
    %c0_17 = arith.constant 0 : index
    %24 = vector.load %arg4[%c0_14, %c1_15, %c0_16, %c0_17] : memref<1x3x16x128xf32, #tpu.memory_space<vmem>>, vector<1x1x16x128xf32>
    %25 = vector.shape_cast %24 : vector<1x1x16x128xf32> to vector<16x128xf32>
    %26 = vector.shape_cast %23 : vector<16x128xf32> to vector<1x1x16x128xf32>
    tpu.vector_store %arg4[%c0_14, %c1_15, %c0_16, %c0_17], %26 {strides = array<i32>} : memref<1x3x16x128xf32, #tpu.memory_space<vmem>>, vector<1x1x16x128xf32>,
    %c0_18 = arith.constant 0 : index
    %c2 = arith.constant 2 : index
    %c0_19 = arith.constant 0 : index
    %c0_20 = arith.constant 0 : index
    %27 = vector.load %arg4[%c0_18, %c2, %c0_19, %c0_20] : memref<1x3x16x128xf32, #tpu.memory_space<vmem>>, vector<1x1x16x128xf32>
    %28 = vector.shape_cast %27 : vector<1x1x16x128xf32> to vector<16x128xf32>
    %29 = arith.addf %28, %14 : vector<16x128xf32>
    %c0_21 = arith.constant 0 : index
    %c2_22 = arith.constant 2 : index
    %c0_23 = arith.constant 0 : index
    %c0_24 = arith.constant 0 : index
    %30 = vector.load %arg4[%c0_21, %c2_22, %c0_23, %c0_24] : memref<1x3x16x128xf32, #tpu.memory_space<vmem>>, vector<1x1x16x128xf32>
    %31 = vector.shape_cast %30 : vector<1x1x16x128xf32> to vector<16x128xf32>
    %32 = vector.shape_cast %29 : vector<16x128xf32> to vector<1x1x16x128xf32>
    tpu.vector_store %arg4[%c0_21, %c2_22, %c0_23, %c0_24], %32 {strides = array<i32>} : memref<1x3x16x128xf32, #tpu.memory_space<vmem>>, vector<1x1x16x128xf32>,
    return
  }
  func.func @transform_0(%arg0: i32, %arg1: i32) -> (i32, i32) {
    %c1_i32 = arith.constant 1 : i32
    %0 = arith.muli %arg0, %c1_i32 : i32
    %1 = arith.addi %0, %arg1 : i32
    %c0_i32 = arith.constant 0 : i32
    %c0_i32_0 = arith.constant 0 : i32
    return %c0_i32, %1 : i32, i32
  }
  func.func @transform_1(%arg0: i32, %arg1: i32) -> (i32, i32) {
    %c1_i32 = arith.constant 1 : i32
    %0 = arith.muli %arg0, %c1_i32 : i32
    %1 = arith.addi %0, %arg1 : i32
    %c0_i32 = arith.constant 0 : i32
    %c0_i32_0 = arith.constant 0 : i32
    return %c0_i32, %1 : i32, i32
  }
  func.func @transform_2(%arg0: i32, %arg1: i32) -> (i32, i32, i32, i32) {
    %c0_i32 = arith.constant 0 : i32
    %c0_i32_0 = arith.constant 0 : i32
    %c0_i32_1 = arith.constant 0 : i32
    %c0_i32_2 = arith.constant 0 : i32
    return %arg0, %c0_i32, %c0_i32_0, %c0_i32_1 : i32, i32, i32, i32
  }
}

</mosaic_0001>

<bundles_post_ra>
// kernel: tpu_custom_call.1
= control target key start
LH: loop header
LB: loop body
LE: loop exit
PB: predicated region body
PF: predicated region fallthrough
CT: control target
= control target key end

     0   :  { %7 = vsyncpa [#allocation3], 0  ;;  %s242_s0 = inlined_call_operand.hbm [shape: f32[16,128], index: 0, kind: input, shape index: {}]   ;;  %s243_s1 = inlined_call_operand.hbm [shape: f32[16,128], index: 1, kind: input, shape index: {}]   ;;  %s244_s2 = inlined_call_operand.hbm [shape: f32[1,3,16,128], index: 2, kind: output, shape index: {}]  }
   0x1   :  { %8 = vsyncpa [#allocation6], 0 }
   0x2   :  { %9 = vsyncpa [#allocation4], 0  ;;  %s17_s11 = sshll.u32 %s242_s0, 4  ;;  %s204_s12 = smov [#allocation2]   ;;  %s18_s11 = int_to_ptr.hbm [resolvable:$true] %s17_s11 }
   0x3   :  { %s19_s13 = sshll.u32 %s204_s12, 4  ;;  %s33_s16 = sshll.u32 %s243_s1, 4  ;;  %s20_s13 = int_to_ptr.vmem [resolvable:$true] %s19_s13  ;;  %s34_s16 = int_to_ptr.hbm [resolvable:$true] %s33_s16 }
   0x4   :  { %s205_s17 = smov 128   ;;  %s206_s18 = smov 8  }
   0x5   :  { %25 = dma.hbm_to_vmem [thread:$0]  %s18_s11, 256, %s20_s13, [#allocation3], %s205_s17, %s205_s17, %s206_s18  }
   0x6   :  { %s207_s19 = smov [#allocation5]  }
   0x7   :  { %s35_s20 = sshll.u32 %s207_s19, 4  ;;  %s36_s20 = int_to_ptr.vmem [resolvable:$true] %s35_s20 }
   0x8   :  { %41 = dma.hbm_to_vmem [thread:$0]  %s34_s16, 256, %s36_s20, [#allocation6], %s205_s17, %s205_s17, %s206_s18  }
   0x9   :  { %198 = dma.done.wait [#allocation3], 256  }
   0xa   :  { %199 = vsyncadd [#allocation3], 4294967040 }
   0xb   :  { %200 = dma.done.wait [#allocation6], 256  }
   0xc   :  { %201 = vsyncadd [#allocation6], 4294967040  ;;  %v62_v0 = vld [vmem:[#allocation2] sm:$0xff]  ;;  %v63_v1 = vld [vmem:[#allocation2 + $0x8] sm:$0xff]  ;;  %s208_s0 = smov [#allocation7]   ;;  %s102_s23 = sshll.u32 %s244_s2, 4  ;;  %s103_s23 = int_to_ptr.hbm [resolvable:$true] %s102_s23 }
   0xd   :  { %v64_v2 = vld [vmem:[#allocation5] sm:$0xff]  ;;  %122 = vtanh.f32 %v62_v0  ;;  %v65_v3 = vld [vmem:[#allocation5 + $0x8] sm:$0xff]  ;;  %s100_s1 = sshll.u32 %s208_s0, 4  ;;  %s101_s1 = int_to_ptr.vmem [resolvable:$true] %s100_s1 }
   0xe   :  { %124 = vtanh.f32 %v63_v1  ;;  %94 = vst [vmem:[#allocation7 + $0x20] sm:$0xff] %v64_v2 }
   0xf   :  { %95 = vst [vmem:[#allocation7 + $0x28] sm:$0xff] %v65_v3 }
  0x13   :  { %v123_v4 = vpop.eup %122 }
  0x14   :  { %v125_v5 = vpop.eup %124  ;;  %v70_v6 = vmul.f32 %v123_v4, %v64_v2  ;;  %80 = vst [vmem:[#allocation7] sm:$0xff] %v123_v4 }
  0x15   :  { %v71_v7 = vmul.f32 %v125_v5, %v65_v3  ;;  %81 = vst [vmem:[#allocation7 + $0x8] sm:$0xff] %v125_v5 }
  0x16   :  { %87 = vst [vmem:[#allocation7 + $0x10] sm:$0xff] %v70_v6 }
  0x17   :  { %88 = vst [vmem:[#allocation7 + $0x18] sm:$0xff] %v71_v7 }
  0x18   :  { %108 = dma.vmem_to_hbm [thread:$0]  %s101_s1, 768, %s103_s23, [#allocation4], %s205_s17, %s205_s17, %s206_s18  }
  0x19   :  { %202 = dma.done.wait [#allocation4], 768  }
  0x1a   :  { %203 = vsyncadd [#allocation4], 4294966528 }
  0x1b   :  { %113 = vsyncpa [#allocation3], 1 }
  0x1c   :  { %114 = vsyncpa [#allocation6], 1 }
  0x1d   :  { %115 = vsyncpa [#allocation4], 1 }

</bundles_post_ra>
